<compile_context>
chip_gen: v5e
topology: v5e:2x2
jax: 0.10.0
libtpu: 0.0.40
codegen_flags: <defaults>
</compile_context>

<pallas_src>
import math

import jax
import jax.numpy as jnp
from jax.experimental import pallas as pl
from jax.experimental.pallas import tpu as pltpu


_LANES = 1024       # lane-dense last dim (multiple of 128)
_ROW_BLOCK = 512    # 512 x 1024 f32 = 2 MiB per stream per pipeline buffer


def _pmask_kernel(alpha_ref, x_ref, noisy_ref, o_ref):
    # Elementwise hot path, whole tile at once. alpha is a scalar in SMEM.
    alpha = alpha_ref[0]
    x = x_ref[...].astype(jnp.float32)
    n = noisy_ref[...].astype(jnp.float32)
    y = jnp.where(x >= 0.0, x, alpha * x)   # PReLU (scalar alpha)
    y = jnp.clip(y, -1.0, 1.0)              # forward value of where(|y|<=1, y, sign(y))
    o_ref[...] = (y * n).astype(o_ref.dtype)


def pmask(x: jax.Array, noisy: jax.Array, alpha) -> jax.Array:
    """Forward of PMask: clip(prelu(x, alpha), -1, 1) * noisy."""
    assert x.shape == noisy.shape, (x.shape, noisy.shape)
    orig_shape = x.shape
    dtype = x.dtype
    total = math.prod(orig_shape) if orig_shape else 1

    # Lane-dense 2-D slab (rows, _LANES); pad the flat tail so the grid divides.
    rows = -(-total // _LANES)
    if rows >= _ROW_BLOCK:
        block_rows = _ROW_BLOCK
        rows_padded = -(-rows // _ROW_BLOCK) * _ROW_BLOCK
    else:
        block_rows = rows            # full (small) second-to-last dim: allowed
        rows_padded = rows
    padded_total = rows_padded * _LANES
    pad = padded_total - total

    x_flat = x.reshape(-1)
    n_flat = noisy.reshape(-1)
    if pad:
        x_flat = jnp.pad(x_flat, (0, pad))
        n_flat = jnp.pad(n_flat, (0, pad))

    x2 = x_flat.reshape(rows_padded, _LANES)
    n2 = n_flat.reshape(rows_padded, _LANES)
    alpha_arr = jnp.asarray(alpha, jnp.float32).reshape(1)

    grid = (rows_padded // block_rows,)

    out2 = pl.pallas_call(
        _pmask_kernel,
        out_shape=jax.ShapeDtypeStruct((rows_padded, _LANES), dtype),
        grid_spec=pltpu.PrefetchScalarGridSpec(
            num_scalar_prefetch=0,
            grid=grid,
            in_specs=[
                pl.BlockSpec(memory_space=pltpu.MemorySpace.SMEM),      # alpha
                pl.BlockSpec((block_rows, _LANES), lambda i: (i, 0)),   # x
                pl.BlockSpec((block_rows, _LANES), lambda i: (i, 0)),   # noisy
            ],
            out_specs=pl.BlockSpec((block_rows, _LANES), lambda i: (i, 0)),
        ),
        compiler_params=pltpu.CompilerParams(
            dimension_semantics=("parallel",),   # shards across v7x's 2 TCs
        ),
    )(alpha_arr, x2, n2)

    out_flat = out2.reshape(-1)
    if pad:
        out_flat = out_flat[:total]
    return out_flat.reshape(orig_shape)


if __name__ == "__main__":
    key = jax.random.PRNGKey(0)
    kx, kn = jax.random.split(key)

    # Small NCHW shapes consistent with the module's usage.
    shape = (2, 4, 16, 16)
    x = jax.random.normal(kx, shape, dtype=jnp.float32) * 2.0   # exercise |x| > 1 branch
    noisy = jax.random.normal(kn, shape, dtype=jnp.float32)
    alpha = jnp.float32(0.25)   # nn.PReLU() default init

    out = jax.block_until_ready(pmask(x, noisy, alpha))

    # Reference in plain JAX (forward semantics of the PyTorch module).
    y = jnp.where(x >= 0.0, x, alpha * x)
    y = jnp.clip(y, -1.0, 1.0)
    ref = y * noisy
    assert out.shape == shape
    assert jnp.allclose(out, ref, atol=1e-6, rtol=1e-6)

    # TODO(synk): the detach()-based straight-through gradient of the clip is a
    # backward-pass trick; only the forward value is implemented here.
    print("KERNEL_OK")
</pallas_src>

<mosaic_0001>
module attributes {stable_mosaic.version = 11 : i64} {
  func.func @_pmask_kernel(%arg0: i32, %arg1: memref<1xf32, #tpu.memory_space<smem>>, %arg2: memref<2x1024xf32, #tpu.memory_space<vmem>>, %arg3: memref<2x1024xf32, #tpu.memory_space<vmem>>, %arg4: memref<2x1024xf32, #tpu.memory_space<vmem>>) attributes {dimension_semantics = [#tpu.dimension_semantics<parallel>], iteration_bounds = array<i64: 1>, scalar_prefetch = 0 : i64, scratch_operands = 0 : i64, tpu.core_type = #tpu.core_type<tc>, window_params = [{transform_indices = @transform_0, window_bounds = array<i64: 1>}, {transform_indices = @transform_1, window_bounds = array<i64: 2, 1024>}, {transform_indices = @transform_2, window_bounds = array<i64: 2, 1024>}, {transform_indices = @transform_3, window_bounds = array<i64: 2, 1024>}]} {
    %c0 = arith.constant 0 : index
    %0 = memref.load %arg1[%c0] : memref<1xf32, #tpu.memory_space<smem>>
    %c0_0 = arith.constant 0 : index
    %c0_1 = arith.constant 0 : index
    %1 = vector.load %arg2[%c0_0, %c0_1] : memref<2x1024xf32, #tpu.memory_space<vmem>>, vector<2x1024xf32>
    %c0_2 = arith.constant 0 : index
    %c0_3 = arith.constant 0 : index
    %2 = vector.load %arg3[%c0_2, %c0_3] : memref<2x1024xf32, #tpu.memory_space<vmem>>, vector<2x1024xf32>
    %cst = arith.constant 0.000000e+00 : f32
    %3 = vector.broadcast %cst : f32 to vector<2x1024xf32>
    %4 = arith.cmpf oge, %1, %3 : vector<2x1024xf32>
    %5 = vector.broadcast %0 : f32 to vector<2x1024xf32>
    %6 = arith.mulf %5, %1 : vector<2x1024xf32>
    %7 = arith.select %4, %1, %6 : vector<2x1024xi1>, vector<2x1024xf32>
    %cst_4 = arith.constant -1.000000e+00 : f32
    %cst_5 = arith.constant 1.000000e+00 : f32
    %8 = vector.broadcast %cst_4 : f32 to vector<2x1024xf32>
    %9 = arith.maximumf %8, %7 : vector<2x1024xf32>
    %10 = vector.broadcast %cst_5 : f32 to vector<2x1024xf32>
    %11 = arith.minimumf %10, %9 : vector<2x1024xf32>
    %12 = arith.mulf %11, %2 : vector<2x1024xf32>
    %c0_6 = arith.constant 0 : index
    %c0_7 = arith.constant 0 : index
    %13 = vector.load %arg4[%c0_6, %c0_7] : memref<2x1024xf32, #tpu.memory_space<vmem>>, vector<2x1024xf32>
    tpu.vector_store %arg4[%c0_6, %c0_7], %12 {strides = array<i32>} : memref<2x1024xf32, #tpu.memory_space<vmem>>, vector<2x1024xf32>,
    return
  }
  func.func @transform_0(%arg0: i32) -> i32 {
    %c0_i32 = arith.constant 0 : i32
    %c0_i32_0 = arith.constant 0 : i32
    return %c0_i32 : i32
  }
  func.func @transform_1(%arg0: i32) -> (i32, i32) {
    %c0_i32 = arith.constant 0 : i32
    %c0_i32_0 = arith.constant 0 : i32
    return %arg0, %c0_i32 : i32, i32
  }
  func.func @transform_2(%arg0: i32) -> (i32, i32) {
    %c0_i32 = arith.constant 0 : i32
    %c0_i32_0 = arith.constant 0 : i32
    return %arg0, %c0_i32 : i32, i32
  }
  func.func @transform_3(%arg0: i32) -> (i32, i32) {
    %c0_i32 = arith.constant 0 : i32
    %c0_i32_0 = arith.constant 0 : i32
    return %arg0, %c0_i32 : i32, i32
  }
}

</mosaic_0001>

<bundles_post_ra>
// kernel: tpu_custom_call.1
= control target key start
LH: loop header
LB: loop body
LE: loop exit
PB: predicated region body
PF: predicated region fallthrough
CT: control target
= control target key end

     0   :  { %9 = vsyncpa [#allocation4], 0  ;;  %s200_s0 = inlined_call_operand.<no memory space> [shape: f32[1], index: 0, kind: input, shape index: {}]   ;;  %s201_s1 = inlined_call_operand.hbm [shape: f32[2,1024], index: 1, kind: input, shape index: {}]   ;;  %s202_s2 = inlined_call_operand.hbm [shape: f32[2,1024], index: 2, kind: input, shape index: {}]   ;;  %s203_s3 = inlined_call_operand.hbm [shape: f32[2,1024], index: 3, kind: output, shape index: {}]  }
   0x1   :  { %10 = vsyncpa [#allocation7], 0 }
   0x2   :  { %11 = vsyncpa [#allocation5], 0  ;;  %s19_s14 = sshll.u32 %s201_s1, 4  ;;  %s165_s15 = smov [#allocation3]   ;;  %s20_s14 = int_to_ptr.hbm [resolvable:$true] %s19_s14 }
   0x3   :  { %s21_s16 = sshll.u32 %s165_s15, 4  ;;  %s30_s19 = sshll.u32 %s202_s2, 4  ;;  %s22_s16 = int_to_ptr.vmem [resolvable:$true] %s21_s16  ;;  %s31_s19 = int_to_ptr.hbm [resolvable:$true] %s30_s19 }
   0x4   :  { %24 = dma.hbm_to_vmem [thread:$0]  %s20_s14, 256, %s22_s16, [#allocation4]  }
   0x5   :  { %s166_s20 = smov [#allocation6]  }
   0x6   :  { %s32_s21 = sshll.u32 %s166_s20, 4  ;;  %s33_s21 = int_to_ptr.vmem [resolvable:$true] %s32_s21 }
   0x7   :  { %35 = dma.hbm_to_vmem [thread:$0]  %s31_s19, 256, %s33_s21, [#allocation7]  }
   0x8   :  { %159 = dma.done.wait [#allocation4], 256  }
   0x9   :  { %160 = vsyncadd [#allocation4], 4294967040 }
   0xa   :  { %161 = dma.done.wait [#allocation7], 256  }
   0xb   :  { %162 = vsyncadd [#allocation7], 4294967040  ;;  %v51_v0 = vstv %s200_s0  ;;  %v45_v1 = vld [vmem:[#allocation3] sm:$0xff]  ;;  %v46_v2 = vld [vmem:[#allocation3 + $0x8] sm:$0xff]  ;;  %s167_s2 = smov [#allocation8]   ;;  %s71_s26 = sshll.u32 %s203_s3, 4  ;;  %s72_s26 = int_to_ptr.hbm [resolvable:$true] %s71_s26 }
   0xc   :  { %vm49_vm0 = vcmp.ge.f32.partialorder %v45_v1, 0.0  ;;  %v52_v3 = vmul.f32 %v51_v0, %v45_v1  ;;  %vm50_vm1 = vcmp.ge.f32.partialorder %v46_v2, 0.0  ;;  %v53_v4 = vmul.f32 %v51_v0, %v46_v2  ;;  %v47_v5 = vld [vmem:[#allocation6] sm:$0xff]  ;;  %v48_v7 = vld [vmem:[#allocation6 + $0x8] sm:$0xff]  ;;  %s69_s23 = sshll.u32 %s167_s2, 4  ;;  %s70_s23 = int_to_ptr.vmem [resolvable:$true] %s69_s23 }
   0xe   :  { %v54_v6 = vsel %vm49_vm0, %v45_v1, %v52_v3  ;;  %v55_v8 = vsel %vm50_vm1, %v46_v2, %v53_v4 }
   0xf   :  { %v82_v9 = vclamps-f32 %v54_v6, 1.0  ;;  %v83_v10 = vclamps-f32 %v55_v8, 1.0 }
  0x11   :  { %v60_v11 = vmul.f32 %v82_v9, %v47_v5  ;;  %v61_v12 = vmul.f32 %v83_v10, %v48_v7 }
  0x13   :  { %62 = vst [vmem:[#allocation8] sm:$0xff] %v60_v11 }
  0x14   :  { %63 = vst [vmem:[#allocation8 + $0x8] sm:$0xff] %v61_v12 }
  0x15   :  { %74 = dma.vmem_to_hbm [thread:$0]  %s70_s23, 256, %s72_s26, [#allocation5]  }
  0x16   :  { %163 = dma.done.wait [#allocation5], 256  }
  0x17   :  { %164 = vsyncadd [#allocation5], 4294967040 }
  0x18   :  { %79 = vsyncpa [#allocation4], 1 }
  0x19   :  { %80 = vsyncpa [#allocation7], 1 }
  0x1a   :  { %81 = vsyncpa [#allocation5], 1 }

</bundles_post_ra>
